<compile_context>
chip_gen: v6e
topology: v6e:2x2x1
jax: 0.10.0
libtpu: 0.0.40
codegen_flags: <defaults>
</compile_context>

<pallas_src>
import jax
import jax.numpy as jnp
from jax.experimental import pallas as pl
from jax.experimental.pallas import tpu as pltpu

# `pl.Squeezed()` drops the size-1 batch dim from the kernel-side view.
# Older JAX spells this as `None` inside block_shape.
_SQUEEZED = pl.Squeezed() if hasattr(pl, "Squeezed") else None
# SMEM memory-space handle (newer: pltpu.MemorySpace.SMEM, older: pltpu.SMEM).
_SMEM = pltpu.MemorySpace.SMEM if hasattr(pltpu, "MemorySpace") else pltpu.SMEM

_TARGET_BLOCK_BYTES = 2 * 1024 * 1024  # ~2 MiB/block -> 4x buffers << 16 MiB


def _choose_row_tile(n_rows: int, row_bytes: int, itemsize: int) -> int:
    """Largest row tile that (a) divides n_rows, (b) is a multiple of the
    sublane packing (8 for 4B, 16 for 2B, 32 for 1B dtypes) and (c) keeps one
    block under ~2 MiB.  Falls back to the full extent (always legal)."""
    if n_rows * row_bytes <= _TARGET_BLOCK_BYTES:
        return n_rows
    mult = max(8, 32 // max(itemsize, 1))
    if n_rows % mult != 0:
        return n_rows
    ts = max(mult, (_TARGET_BLOCK_BYTES // max(row_bytes, 1)) // mult * mult)
    while ts > mult and n_rows % ts != 0:
        ts -= mult
    return ts


def _drop_path_kernel(scale_ref, x_ref, o_ref):
    # scale_ref: (B,) f32 in SMEM  (per-sample mask / keep_prob)
    # x_ref/o_ref: (row_tile, H) VMEM tile of sample b (batch dim squeezed)
    scale = scale_ref[pl.program_id(0)]
    o_ref[...] = (x_ref[...].astype(jnp.float32) * scale).astype(o_ref.dtype)


def drop_path_pallas(x: jax.Array,
                     drop_prob: float = 0.0,
                     training: bool = False,
                     key: jax.Array | None = None) -> jax.Array:
    """Pallas implementation of VJEPA2DropPath.forward."""
    if drop_prob == 0.0 or not training:
        # Matches PyTorch: identity, no RNG consumed.
        return x
    if key is None:
        key = jax.random.PRNGKey(0)

    keep_prob = 1.0 - drop_prob
    b = x.shape[0]
    # random_tensor = floor(keep_prob + U[0,1)) -> per-sample {0,1}; the mask
    # and 1/keep_prob are folded into a single f32 scale computed in plain JAX.
    rand = jax.random.uniform(key, (b,), dtype=jnp.float32)
    scale = jnp.floor(keep_prob + rand) / keep_prob  # (B,) f32

    # Collapse to (B, rows, H) so the last two block dims stay (8,128)-legal
    # (H is always the full trailing dim of the block).
    orig_shape = x.shape
    if x.ndim >= 3:
        x3 = x.reshape(b, -1, orig_shape[-1])
    elif x.ndim == 2:
        x3 = x.reshape(b, 1, orig_shape[-1])
    else:
        x3 = x.reshape(b, 1, 1)
    _, n_rows, h = x3.shape

    itemsize = x3.dtype.itemsize
    ts = _choose_row_tile(n_rows, h * itemsize, itemsize)
    data_spec = pl.BlockSpec((_SQUEEZED, ts, h), lambda i, j: (i, j, 0))

    out3 = pl.pallas_call(
        _drop_path_kernel,
        out_shape=jax.ShapeDtypeStruct(x3.shape, x3.dtype),
        grid_spec=pltpu.PrefetchScalarGridSpec(
            num_scalar_prefetch=0,
            grid=(b, n_rows // ts),
            in_specs=[
                pl.BlockSpec(memory_space=_SMEM),  # (B,) scale, untiled SMEM
                data_spec,
            ],
            out_specs=data_spec,
        ),
        # inputs are (scale, x3): alias x3 -> output (pure in-place rescale).
        input_output_aliases={1: 0},
        compiler_params=pltpu.CompilerParams(
            dimension_semantics=("parallel", "parallel"),
            vmem_limit_bytes=32 * 1024 * 1024,
        ),
    )(scale, x3)

    return out3.reshape(orig_shape)


if __name__ == "__main__":
    key = jax.random.PRNGKey(0)
    k_x, k_mask = jax.random.split(key)

    # Small shape consistent with a transformer residual branch: (B, S, H)
    B, S, H = 2, 8, 32
    x = jax.random.normal(k_x, (B, S, H), dtype=jnp.float32)

    drop_prob = 0.25
    keep_prob = 1.0 - drop_prob

    # --- training path (kernel exercised) ---
    out_train = drop_path_pallas(x, drop_prob=drop_prob, training=True, key=k_mask)
    out_train = jax.block_until_ready(out_train)

    # Pure-JAX reference of the same semantics (same RNG draw).
    rand = jax.random.uniform(k_mask, (B,), dtype=jnp.float32)
    scale_ref = (jnp.floor(keep_prob + rand) / keep_prob).reshape(B, 1, 1)
    ref_train = (x.astype(jnp.float32) * scale_ref).astype(x.dtype)
    assert jnp.allclose(out_train, ref_train, atol=1e-6), "training-path mismatch"

    # --- eval path (identity, matches drop_prob==0.0 / not training) ---
    out_eval = drop_path_pallas(x, drop_prob=drop_prob, training=False)
    out_eval = jax.block_until_ready(out_eval)
    assert jnp.allclose(out_eval, x), "eval-path mismatch"

    print("KERNEL_OK")
</pallas_src>

<mosaic_0001>
module attributes {stable_mosaic.version = 11 : i64} {
  func.func @_drop_path_kernel(%arg0: i32, %arg1: i32, %arg2: memref<2xf32, #tpu.memory_space<smem>>, %arg3: memref<1x8x32xf32, #tpu.memory_space<vmem>>, %arg4: memref<1x8x32xf32, #tpu.memory_space<vmem>>) attributes {dimension_semantics = [#tpu.dimension_semantics<parallel>, #tpu.dimension_semantics<parallel>], iteration_bounds = array<i64: 2, 1>, scalar_prefetch = 0 : i64, scratch_operands = 0 : i64, tpu.core_type = #tpu.core_type<tc>, window_params = [{transform_indices = @transform_0, window_bounds = array<i64: 2>}, {transform_indices = @transform_1, window_bounds = array<i64: 1, 8, 32>}, {transform_indices = @transform_2, window_bounds = array<i64: 1, 8, 32>}]} {
    %0 = arith.index_cast %arg0 : i32 to index
    %1 = memref.load %arg2[%0] : memref<2xf32, #tpu.memory_space<smem>>
    %c0 = arith.constant 0 : index
    %c0_0 = arith.constant 0 : index
    %c0_1 = arith.constant 0 : index
    %2 = vector.load %arg3[%c0, %c0_0, %c0_1] : memref<1x8x32xf32, #tpu.memory_space<vmem>>, vector<1x8x32xf32>
    %3 = vector.shape_cast %2 : vector<1x8x32xf32> to vector<8x32xf32>
    %4 = vector.broadcast %1 : f32 to vector<8x32xf32>
    %5 = arith.mulf %3, %4 : vector<8x32xf32>
    %c0_2 = arith.constant 0 : index
    %c0_3 = arith.constant 0 : index
    %c0_4 = arith.constant 0 : index
    %6 = vector.load %arg4[%c0_2, %c0_3, %c0_4] : memref<1x8x32xf32, #tpu.memory_space<vmem>>, vector<1x8x32xf32>
    %7 = vector.shape_cast %6 : vector<1x8x32xf32> to vector<8x32xf32>
    %8 = vector.shape_cast %5 : vector<8x32xf32> to vector<1x8x32xf32>
    tpu.vector_store %arg4[%c0_2, %c0_3, %c0_4], %8 {strides = array<i32>} : memref<1x8x32xf32, #tpu.memory_space<vmem>>, vector<1x8x32xf32>,
    return
  }
  func.func @transform_0(%arg0: i32, %arg1: i32) -> i32 {
    %c0_i32 = arith.constant 0 : i32
    %c0_i32_0 = arith.constant 0 : i32
    return %c0_i32 : i32
  }
  func.func @transform_1(%arg0: i32, %arg1: i32) -> (i32, i32, i32) {
    %c0_i32 = arith.constant 0 : i32
    %c0_i32_0 = arith.constant 0 : i32
    return %arg0, %arg1, %c0_i32 : i32, i32, i32
  }
  func.func @transform_2(%arg0: i32, %arg1: i32) -> (i32, i32, i32) {
    %c0_i32 = arith.constant 0 : i32
    %c0_i32_0 = arith.constant 0 : i32
    return %arg0, %arg1, %c0_i32 : i32, i32, i32
  }
}

</mosaic_0001>

<bundles_post_ra>
// kernel: tpu_custom_call.1
= control target key start
LH: loop header
LB: loop body
LE: loop exit
PB: predicated region body
PF: predicated region fallthrough
CT: control target
= control target key end

     0   :  { %7 = vsyncpa [#allocation5], 0  ;;  %s700_s0 = inlined_call_operand.vmem [shape: f32[2], index: 0, kind: input, shape index: {}]   ;;  %s701_s1 = inlined_call_operand.hbm [shape: f32[2,8,32], index: 1, kind: input, shape index: {}, may-alias: {1,2}]   ;;  %s702_s2 = inlined_call_operand.hbm [shape: f32[2,8,32], index: 2, kind: output, shape index: {}, may-alias: {1,2}]  }
   0x1   :  { %8 = vsyncpa [#allocation3], 0 }
   0x2   :  { %10 = vsyncpa [#allocation3 + $0x1], 0 }
   0x3   :  { %11 = vsyncpa [#allocation4], 0 }
   0x4   :  { %13 = vsyncpa [#allocation4 + $0x1], 0  ;;  %s538_s9 = smov 0   ;;  %s540_s10 = smov 0  }
   0x5   :  { %s542_s11 = smov 0   ;;  %s544_s12 = smov 0  }
   0x6   :  { %s546_s13 = smov 0   ;;  %s548_s14 = smov 0  }
   0x7 LB: > { %s303_s15 = sadd.s32 4294967295, %s518_s14   ;;  %s304_s16 = sadd.s32 4294967294, %s518_s14   ;;  %s518_s14 = sphi %s548_s14, %s19_s14   ;;  %s514_s13 = sphi %s546_s13, %s719_s13   ;;  %s510_s12 = sphi %s544_s12, %s718_s12   ;;  %s506_s11 = sphi %s542_s11, %s717_s11   ;;  %s502_s10 = sphi %s540_s10, %s716_s10   ;;  %s498_s9 = sphi %s538_s9, %s715_s9  }
   0x8   : > { %p74_p0 = scmp.ne.s32.totalorder %s502_s10, %s498_s9  ;;  %p572_p1 = scmp.eq.s32.totalorder %s303_s15, 0 }
   0x9   : > { %p576_p2 = scmp.eq.s32.totalorder %s303_s15, 1  ;;  %p106_p3 = scmp.eq.s32.totalorder %s304_s16, 1 }
   0xa   : > { %p582_p4 = por %p572_p1, %p74_p0  ;;  %p305_p5 = scmp.ge.s32.totalorder %s518_s14, 1 }
   0xb   : > { %p587_p6 = por %p106_p3, %p74_p0  ;;  %p113_p7 = scmp.lt.s32.totalorder %s518_s14, 3 }
   0xc   : > { %s706_s19 = scalar_select %p582_p4, 1, 0 }
   0xd   : > { %s707_s20 = scalar_select %p587_p6, 1, 0 }
   0xe   : > { %s126_s23 = sshll.u32 %s700_s0, 4  ;;  %p595_p8 = pnand %p305_p5, %p113_p7  ;;  %s127_s23 = int_to_ptr.vmem [resolvable:$true] %s126_s23 }
   0xf   : > { %s31_s26 = sadd.s32 1, %s514_s13  ;;  %s61_s27 = sadd.s32 1, %s506_s11 }
  0x10   : > { %p326_p10 = pneg %p595_p8  ;;  %p33_p12 = scmp.ge.s32.totalorder %s31_s26, 2 }
  0x11   : > { %s391_s28 = scalar_lea.vmem %s127_s23, 16  ;;  %p399_p7 = scmp.lt.s32.totalorder %s127_s23, %s127_s23 }
  0x12   : > { %p604_p11 = pnand %p326_p10, %p572_p1  ;;  %p392_p13 = scmp.ne.s32.totalorder %s127_s23, %s391_s28 }
  0x13   : > { %p400_p6 = scmp.lt.s32.totalorder %s391_s28, %s391_s28 }
  0x14   : > { %p393_p0 = pneg %p604_p11 }
  0x15   : > { %p401_p9 = por %p400_p6, %p399_p7 }
  0x16   : > { %p394_p3 = pnand %p393_p0, %p392_p13 }
  0x18   : > { %p395_p5 = pneg %p394_p3 }
  0x1a   : > { %p402_p4 = pnand %p401_p9, %p395_p5 }
  0x1c   : > { %405 = shalt.err (!%p402_p4)
}
  0x1d   : > { %s520_s29 = smov [#allocation2]   ;;  %s721_s26 = smov (%p33_p12, %s31_s26), 0 }
  0x1e   : > { %329 = dma.vmem_to_smem (!%p604_p11), %s127_s23, 16, %s520_s29, [#allocation5]  }
  0x1f   : > { %p68_p10 = scmp.ne.s32.totalorder %s506_s11, %s502_s10  ;;  %p69_p6 = scmp.eq.s32.totalorder %s518_s14, 0 }
  0x20   : > { %s56_s30 = ssub.s32 %s514_s13, %s721_s26  ;;  %p339_p4 = scmp.lt.s32.totalorder %s518_s14, 2 }
  0x21   : > { %p59_p9 = scmp.eq.s32.totalorder %s56_s30, 0  ;;  %p70_p13 = por %p69_p6, %p68_p10 }
  0x22   : > { %p624_p0 = por %p576_p2, %p68_p10  ;;  %s137_s4 = sand.u32 1, %s506_s11  }
  0x23   : > { %s630_s5 = scalar_select %p59_p9, %s506_s11, %s61_s27  }
  0x24   : > { %s308_s6 = sshll.u32 %s137_s4, 3  ;;  %s309_s7 = sshll.u32 %s514_s13, 7 }
  0x25   : > { %s147_s16 = scalar_lea.hbm %s701_s1, %s309_s7  ;;  %s141_s21 = scalar_lea.vmem [#allocation6], %s308_s6 }
  0x26   : > { %s149_s22 = sshll.u32 %s141_s21, 4  ;;  %p636_p11 = pnand %p339_p4, %p70_p13  ;;  %s150_s22 = int_to_ptr.vmem [resolvable:$true] %s149_s22 }
  0x27   : > { %s138_s18 = scalar_lea.sflag [#allocation3], %s137_s4  ;;  %s419_s25 = scalar_lea.vmem %s150_s22, 128 }
  0x28   : > { %p408_p2 = pneg %p636_p11  ;;  %p420_p12 = scmp.ne.s32.totalorder %s150_s22, %s419_s25 }
  0x29   : > { %s521_s27 = smov [#allocation6]  }
  0x2a   : > { %p422_p3 = pnand %p420_p12, %p408_p2  ;;  %s424_s28 = sshll.u32 %s521_s27, 4  ;;  %s425_s28 = int_to_ptr.vmem [resolvable:$false] %s424_s28 }
  0x2b   : > { %s426_s29 = scalar_lea.vmem %s425_s28, 256  ;;  %p427_p7 = scmp.lt.s32.totalorder %s150_s22, %s425_s28 }
  0x2c   : > { %p423_p5 = pneg %p422_p3  ;;  %p428_p10 = scmp.lt.s32.totalorder %s426_s29, %s419_s25 }
  0x2e   : > { %p429_p6 = por %p428_p10, %p427_p7 }
  0x30   : > { %p430_p9 = pnand %p429_p6, %p423_p5 }
  0x32   : > { %433 = shalt.err (!%p430_p9)
}
  0x33   : > { %333 = dma.hbm_to_vmem [thread:$0]  (!%p636_p11), %s147_s16, 128, %s150_s22, %s138_s18  }
  0x34   : > { %158 = sbr.rel (%p595_p8) target bundleno = 88 (0x58), region = 28 }
  0x39   : > { %485 = dma.done.wait (%p572_p1), [#allocation5], 16  }
  0x3a   : > { %487 = vsyncadd (%p572_p1), [#allocation5], 4294967280  ;;  %s651_s30 = sand.u32 1, %s502_s10   ;;  %p712_p4 = scmp.ne.s32.totalorder %s706_s19, 0 }
  0x3b   : > { %s312_s4 = sshll.u32 %s651_s30, 3  ;;  %s165_s6 = scalar_lea.sflag [#allocation3], %s651_s30 }
  0x3c   : > { %s168_s7 = scalar_lea.vmem [#allocation6], %s312_s4 }
  0x3d   : > { %489 = dma.done.wait (%p712_p4), %s165_s6, 128  }
  0x3e   : > { %491 = vsyncadd (%p712_p4), %s165_s6, 4294967168 }
  0x3f   : > { %173 = sfence }
  0x40   : > { %s190_s17 = sld [smem:[#allocation2 + %s510_s12]]  ;;  %v191_v0 = vld [vmem:[%s168_s7] sm:$0xff]  ;;  %s189_s24 = scalar_lea.vmem [#allocation7], %s312_s4  ;;  %vm194_vm0 = vcmask 261120  }
  0x41   : > { %s211_s8 = sshll.u32 %s189_s24, 4  ;;  %s315_s15 = sshll.u32 %s510_s12, 7  ;;  %s212_s8 = int_to_ptr.vmem [resolvable:$true] %s211_s8 }
  0x42   : > { %s209_s22 = scalar_lea.hbm %s702_s2, %s315_s15  ;;  %s197_s19 = scalar_lea.sflag [#allocation4], %s651_s30 }
  0x43   : > { %s434_s23 = scalar_lea.vmem %s212_s8, 128  ;;  %s522_s18 = smov [#allocation7]  }
  0x44   : > { %p435_p1 = scmp.ne.s32.totalorder %s212_s8, %s434_s23  ;;  %s438_s25 = sshll.u32 %s522_s18, 4  ;;  %s439_s25 = int_to_ptr.vmem [resolvable:$false] %s438_s25 }
  0x45   : > { %s440_s27 = scalar_lea.vmem %s439_s25, 256  ;;  %p441_p11 = scmp.lt.s32.totalorder %s212_s8, %s439_s25 }
  0x46   : > { %v192_v1 = vstv %s190_s17  ;;  %p436_p8 = pnand %p435_p1, %p624_p0  ;;  %p442_p2 = scmp.lt.s32.totalorder %s440_s27, %s434_s23 }
  0x47   : > { %v193_v2 = vmul.f32 %v192_v1, %v191_v0 }
  0x48   : > { %p437_p13 = pneg %p436_p8  ;;  %p443_p12 = por %p442_p2, %p441_p11 }
  0x49   : > { %195 = vst.msk [vmem:[%s189_s24] sm:$0xff] %vm194_vm0, %v193_v2 }
  0x4a   : > { %p444_p3 = pnand %p443_p12, %p437_p13 }
  0x4c   : > { %447 = shalt.err (!%p444_p3)
}
  0x4d   : > { %s448_s12 = scalar_lea.hbm %s209_s22, 128  ;;  %s452_s30 = scalar_lea.hbm %s702_s2, 256 }
  0x4e   : > { %p449_p5 = scmp.ne.s32.totalorder %s209_s22, %s448_s12  ;;  %p453_p6 = scmp.lt.s32.totalorder %s209_s22, %s702_s2 }
  0x4f   : > { %p454_p9 = scmp.lt.s32.totalorder %s452_s30, %s448_s12 }
  0x50   : > { %p450_p7 = pnand %p449_p5, %p624_p0 }
  0x51   : > { %p455_p4 = por %p454_p9, %p453_p6 }
  0x52   : > { %p451_p10 = pneg %p450_p7 }
  0x54   : > { %p456_p1 = pnand %p455_p4, %p451_p10 }
  0x56   : > { %459 = shalt.err (!%p456_p1)
}
  0x57   : > { %324 = dma.vmem_to_hbm [thread:$0]  (%p624_p0), %s212_s8, 128, %s209_s22, %s197_s19  }
  0x58 PF: > { %s223_s7 = sand.u32 1, %s498_s9   ;;  %p713_p8 = scmp.ne.s32.totalorder %s707_s20, 0 }
  0x59   : > { %p714_p13 = scmp.ge.s32.totalorder %s518_s14, 2  ;;  %s224_s17 = scalar_lea.sflag [#allocation4], %s223_s7 }
  0x5b   : > { %p335_p11 = pnand %p714_p13, %p713_p8 }
  0x5d   : > { %p336_p2 = pneg %p335_p11 }
  0x5f   : > { %493 = dma.done.wait (%p336_p2), %s224_s17, 128  }
  0x60   : > { %495 = vsyncadd (%p336_p2), %s224_s17, 4294967168  ;;  %s19_s14 = sadd.s32 1, %s518_s14   ;;  %s715_s9 = smov %s502_s10 }
  0x61   : > { %p16_p12 = scmp.ge.s32.totalorder %s19_s14, 4   ;;  %s716_s10 = smov %s506_s11 }
  0x62   : > { %s717_s11 = smov %s630_s5  ;;  %s718_s12 = smov %s514_s13 }
  0x63   : > { %s719_s13 = smov %s721_s26  ;;  %18 = sbr.rel (!%p16_p12) target bundleno = 7 (0x7), region = 78 }
  0x68   :  { %229 = vsyncpa [#allocation3], 1 }
  0x69   :  { %231 = vsyncpa [#allocation3 + $0x1], 1 }
  0x6a   :  { %232 = vsyncpa [#allocation4], 1 }
  0x6b   :  { %234 = vsyncpa [#allocation4 + $0x1], 1 }
  0x6c   :  { %235 = vsyncpa [#allocation5], 1 }
  0x6d   :  { %237 = vsyncpa [#allocation5 + $0x1], 1 }

</bundles_post_ra>
